<compile_context>
chip_gen: v7x
topology: tpu7x:2x2x1
jax: 0.10.0
libtpu: 0.0.40
codegen_flags: <defaults>
</compile_context>

<pallas_src>
import functools
import math

import jax
import jax.numpy as jnp
from jax.experimental import pallas as pl
from jax.experimental.pallas import tpu as pltpu


@functools.lru_cache(maxsize=None)
def _vmem_limit():
  """Generation-aware VMEM budget: ~0.75x physical capacity (96 MiB v5e/v6e, 48 MiB v7x)."""
  cap = 128 * 1024 * 1024
  try:
    if hasattr(pltpu, "get_tpu_info"):
      info = pltpu.get_tpu_info()
      cap = int(getattr(info, "vmem_capacity_bytes", cap))
  except Exception:
    pass
  return max((cap * 3) // 4, 32 * 1024 * 1024)


# TODO(synk): nn.GELU() defaults to the exact erf formulation; we use the tanh approximation
# (GPT-2's own "gelu_new") everywhere for robust Mosaic lowering.
def _gelu_tanh(x):
  return 0.5 * x * (1.0 + jnp.tanh(0.7978845608028654 * (x + 0.044715 * x * x * x)))


def _pick_tile(dim, prefs):
  """Largest preferred tile that evenly divides `dim`, else the full dim (keeps (8,128) rule)."""
  for p in prefs:
    if p <= dim and dim % p == 0:
      return p
  return dim


def _fit_tiles(tm, tn, m_dim, n_dim, footprint, budget):
  """Halve tiles (largest first) until the estimated VMEM footprint fits the budget."""
  def can_halve(t, dim):
    return t > 128 and t % 2 == 0 and dim % (t // 2) == 0

  while footprint(tm, tn) > budget:
    if tn >= tm and can_halve(tn, n_dim):
      tn //= 2
    elif can_halve(tm, m_dim):
      tm //= 2
    elif can_halve(tn, n_dim):
      tn //= 2
    else:
      break
  return tm, tn


# ----------------------------- Pallas kernels ------------------------------


def _ln_linear_kernel(x_ref, g_ref, b_ref, w_ref, bias_ref, o_ref, ln_ref, *, activation):
  # Fused LayerNorm -> matmul (+ optional GELU).  The LN result (bf16) is computed once per
  # row tile (j == 0) into VMEM scratch and reused for every output tile j.
  @pl.when(pl.program_id(1) == 0)
  def _():
    x = x_ref[...]
    mu = jnp.mean(x, axis=-1, keepdims=True)
    var = jnp.mean(jnp.square(x - mu), axis=-1, keepdims=True)
    ln = (x - mu) * jax.lax.rsqrt(var + 1e-5) * g_ref[...] + b_ref[...]
    ln_ref[...] = ln.astype(jnp.bfloat16)

  y = jnp.dot(ln_ref[...], w_ref[...], preferred_element_type=jnp.float32) + bias_ref[...]
  if activation == "gelu":
    y = _gelu_tanh(y)
  o_ref[...] = y.astype(o_ref.dtype)


def ln_linear(x2d, gamma, beta, w, bias, activation="none", out_dtype=jnp.bfloat16):
  n, d = x2d.shape
  dout = w.shape[1]
  limit = _vmem_limit()
  out_bytes = jnp.dtype(out_dtype).itemsize
  tm = _pick_tile(n, (1024, 512, 256, 128))
  tn = _pick_tile(dout, (1024, 512, 256, 128))

  def footprint(tm_, tn_):
    return (2 * tm_ * d * 4          # x (f32, double-buffered)
            + 2 * d * tn_ * 2        # weights (bf16)
            + 2 * tm_ * tn_ * out_bytes
            + tm_ * d * 2            # LN scratch (bf16)
            + 2 * (2 * d + tn_) * 4)

  tm, tn = _fit_tiles(tm, tn, n, dout, footprint, int(limit * 0.8))
  return pl.pallas_call(
      functools.partial(_ln_linear_kernel, activation=activation),
      grid=(n // tm, dout // tn),
      in_specs=[
          pl.BlockSpec((tm, d), lambda i, j: (i, 0)),
          pl.BlockSpec((1, d), lambda i, j: (0, 0)),
          pl.BlockSpec((1, d), lambda i, j: (0, 0)),
          pl.BlockSpec((d, tn), lambda i, j: (0, j)),
          pl.BlockSpec((1, tn), lambda i, j: (0, j)),
      ],
      out_specs=pl.BlockSpec((tm, tn), lambda i, j: (i, j)),
      out_shape=jax.ShapeDtypeStruct((n, dout), out_dtype),
      scratch_shapes=[pltpu.VMEM((tm, d), jnp.bfloat16)],
      compiler_params=pltpu.CompilerParams(
          # j must stay sequential on one core: the LN scratch is carried across j.
          dimension_semantics=("parallel", "arbitrary"),
          vmem_limit_bytes=limit),
  )(x2d, gamma, beta, w, bias)


def _linear_residual_kernel(x_ref, w_ref, bias_ref, r_ref, o_ref):
  # Single full-K matmul per (i, j) tile; bias + residual fused into the store.
  y = jnp.dot(x_ref[...].astype(jnp.bfloat16), w_ref[...],
              preferred_element_type=jnp.float32)
  o_ref[...] = y + bias_ref[...] + r_ref[...]


def _linear_residual_acc_kernel(x_ref, w_ref, bias_ref, r_ref, o_ref, acc_ref):
  # K-tiled fallback with f32 VMEM accumulator (only used when `din` is too large for full-K).
  @pl.when(pl.program_id(2) == 0)
  def _():
    acc_ref[...] = jnp.zeros_like(acc_ref)

  acc_ref[...] += jnp.dot(x_ref[...].astype(jnp.bfloat16), w_ref[...],
                          preferred_element_type=jnp.float32)

  @pl.when(pl.program_id(2) == pl.num_programs(2) - 1)
  def _():
    o_ref[...] = acc_ref[...] + bias_ref[...] + r_ref[...]


def linear_residual(x2d, w, bias, resid2d):
  n, din = x2d.shape
  dout = w.shape[1]
  limit = _vmem_limit()
  budget = int(limit * 0.8)
  x_bytes = jnp.dtype(x2d.dtype).itemsize
  tm = _pick_tile(n, (1024, 512, 256, 128))
  tn = _pick_tile(dout, (1024, 512, 256, 128))

  def footprint(tm_, tn_):
    return (2 * tm_ * din * x_bytes   # x (double-buffered)
            + 2 * din * tn_ * 2       # weights (bf16)
            + 2 * tm_ * tn_ * 4       # residual (f32)
            + 2 * tm_ * tn_ * 4       # output (f32)
            + 2 * tn_ * 4)

  tm, tn = _fit_tiles(tm, tn, n, dout, footprint, budget)

  if footprint(tm, tn) <= budget:
    return pl.pallas_call(
        _linear_residual_kernel,
        grid=(n // tm, dout // tn),
        in_specs=[
            pl.BlockSpec((tm, din), lambda i, j: (i, 0)),
            pl.BlockSpec((din, tn), lambda i, j: (0, j)),
            pl.BlockSpec((1, tn), lambda i, j: (0, j)),
            pl.BlockSpec((tm, tn), lambda i, j: (i, j)),
        ],
        out_specs=pl.BlockSpec((tm, tn), lambda i, j: (i, j)),
        out_shape=jax.ShapeDtypeStruct((n, dout), jnp.float32),
        compiler_params=pltpu.CompilerParams(
            dimension_semantics=("parallel", "parallel"),
            vmem_limit_bytes=limit),
    )(x2d, w, bias, resid2d)

  # Very large `din` fallback: K-tiled reduction with an f32 accumulator.
  tk = _pick_tile(din, (512, 256, 128))
  return pl.pallas_call(
      _linear_residual_acc_kernel,
      grid=(n // tm, dout // tn, din // tk),
      in_specs=[
          pl.BlockSpec((tm, tk), lambda i, j, k: (i, k)),
          pl.BlockSpec((tk, tn), lambda i, j, k: (k, j)),
          pl.BlockSpec((1, tn), lambda i, j, k: (0, j)),
          pl.BlockSpec((tm, tn), lambda i, j, k: (i, j)),
      ],
      out_specs=pl.BlockSpec((tm, tn), lambda i, j, k: (i, j)),
      out_shape=jax.ShapeDtypeStruct((n, dout), jnp.float32),
      scratch_shapes=[pltpu.VMEM((tm, tn), jnp.float32)],
      compiler_params=pltpu.CompilerParams(
          dimension_semantics=("parallel", "parallel", "arbitrary"),
          vmem_limit_bytes=limit),
  )(x2d, w, bias, resid2d)


def _attention_kernel(q_ref, k_ref, v_ref, m_ref, o_ref, *, scale):
  # One (batch, head) pair per grid step.  Scale folded into q; causal + padding bias built
  # once; softmax normalization applied after the PV matmul via an approx EUP reciprocal.
  q = q_ref[0, 0] * scale            # (T, dh) bf16 (scale is a power of two for pow2 head dims)
  k = k_ref[0, 0]                    # (T, dh) bf16
  v = v_ref[0, 0]                    # (T, dh) bf16
  t = q.shape[0]

  row = jax.lax.broadcasted_iota(jnp.int32, (t, t), 0)
  col = jax.lax.broadcasted_iota(jnp.int32, (t, t), 1)
  bias = jnp.where(col <= row, 0.0, -1e4) + m_ref[0]   # causal + padding, f32, (T, T)

  # TODO(synk): for long sequences convert to an online-softmax (flash) form with a KV-tile
  # grid axis instead of materializing the full (T, T) score matrix.
  s = jax.lax.dot_general(q, k, (((1,), (1,)), ((), ())),
                          preferred_element_type=jnp.float32) + bias
  s = s - jnp.max(s, axis=-1, keepdims=True)
  p = jnp.exp(s)
  inv = pl.reciprocal(jnp.sum(p, axis=-1, keepdims=True), approx=True)   # (T, 1) on the EUP
  o = jnp.dot(p.astype(jnp.bfloat16), v, preferred_element_type=jnp.float32) * inv
  o_ref[0, 0] = o.astype(o_ref.dtype)


def attention(q, k, v, mask_add, scale):
  # q, k, v: (B, H, T, dh) bf16; mask_add: (B, 1, T) f32 additive padding mask.
  B, H, T, dh = q.shape
  limit = _vmem_limit()
  return pl.pallas_call(
      functools.partial(_attention_kernel, scale=scale),
      grid=(B, H),
      in_specs=[
          pl.BlockSpec((1, 1, T, dh), lambda b, h: (b, h, 0, 0)),
          pl.BlockSpec((1, 1, T, dh), lambda b, h: (b, h, 0, 0)),
          pl.BlockSpec((1, 1, T, dh), lambda b, h: (b, h, 0, 0)),
          pl.BlockSpec((1, 1, T), lambda b, h: (b, 0, 0)),
      ],
      out_specs=pl.BlockSpec((1, 1, T, dh), lambda b, h: (b, h, 0, 0)),
      out_shape=jax.ShapeDtypeStruct((B, H, T, dh), jnp.bfloat16),
      compiler_params=pltpu.CompilerParams(
          dimension_semantics=("parallel", "parallel"),   # B*H steps -> megacore friendly
          vmem_limit_bytes=limit),
  )(q, k, v, mask_add)


def _lnf_adapter_logits_kernel(x_ref, g_ref, b_ref, aw_ref, ab_ref, wte_ref, o_ref, h2_ref):
  # Final LN + adapter (+ residual) computed once per row tile (vocab index j == 0) into a
  # bf16 VMEM scratch, then reused for every vocab tile.  Logits contract against wte directly
  # (dim 1 of both operands) -- wte.T is never materialized.
  @pl.when(pl.program_id(1) == 0)
  def _():
    x = x_ref[...]
    mu = jnp.mean(x, axis=-1, keepdims=True)
    var = jnp.mean(jnp.square(x - mu), axis=-1, keepdims=True)
    ln = (x - mu) * jax.lax.rsqrt(var + 1e-5) * g_ref[...] + b_ref[...]
    adapted = _gelu_tanh(
        jnp.dot(ln.astype(jnp.bfloat16), aw_ref[...],
                preferred_element_type=jnp.float32) + ab_ref[...])
    h2_ref[...] = (ln + adapted).astype(jnp.bfloat16)

  o_ref[...] = jax.lax.dot_general(
      h2_ref[...], wte_ref[...],
      (((1,), (1,)), ((), ())), preferred_element_type=jnp.float32)


def final_ln_adapter_logits(x2d, gamma, beta, adapter_w, adapter_b, wte):
  n, d = x2d.shape
  v = wte.shape[0]
  limit = _vmem_limit()

  # Pad the vocab so the vocab axis always tiles instead of falling back to the full dim
  # (at GPT-2 scale 50257 -> 51200); padded logits are sliced off in the wrapper.
  v_round = 2048 if v >= 2048 else 128
  v_pad = -(-v // v_round) * v_round
  wte_p = jnp.pad(wte, ((0, v_pad - v), (0, 0))) if v_pad != v else wte

  tm = _pick_tile(n, (512, 256, 128))
  tv = _pick_tile(v_pad, (2048, 1024, 512, 256, 128))

  def footprint(tm_, tv_):
    return (2 * tm_ * d * 4        # x (f32)
            + 2 * tv_ * d * 2      # wte tile (bf16)
            + 2 * tm_ * tv_ * 4    # logits tile (f32)
            + 2 * d * d * 2        # adapter weight (bf16)
            + tm_ * d * 2          # h2 scratch (bf16)
            + 4 * d * 4)

  tm, tv = _fit_tiles(tm, tv, n, v_pad, footprint, int(limit * 0.8))

  logits = pl.pallas_call(
      _lnf_adapter_logits_kernel,
      grid=(n // tm, v_pad // tv),
      in_specs=[
          pl.BlockSpec((tm, d), lambda i, j: (i, 0)),
          pl.BlockSpec((1, d), lambda i, j: (0, 0)),
          pl.BlockSpec((1, d), lambda i, j: (0, 0)),
          pl.BlockSpec((d, d), lambda i, j: (0, 0)),
          pl.BlockSpec((1, d), lambda i, j: (0, 0)),
          pl.BlockSpec((tv, d), lambda i, j: (j, 0)),
      ],
      out_specs=pl.BlockSpec((tm, tv), lambda i, j: (i, j)),
      out_shape=jax.ShapeDtypeStruct((n, v_pad), jnp.float32),
      scratch_shapes=[pltpu.VMEM((tm, d), jnp.bfloat16)],
      compiler_params=pltpu.CompilerParams(
          dimension_semantics=("parallel", "arbitrary"),
          vmem_limit_bytes=limit),
  )(x2d, gamma, beta, adapter_w, adapter_b, wte_p)
  return logits[:, :v] if v_pad != v else logits


# ----------------------------- model (glue) ------------------------------


def init_params(key, vocab, max_pos, d, n_layers, n_heads, scale=0.02):
  keys = jax.random.split(key, 4 + n_layers)
  bf16 = jnp.bfloat16

  def normal(k, shape, dtype=jnp.float32):
    return (scale * jax.random.normal(k, shape, dtype=jnp.float32)).astype(dtype)

  params = {
      "num_heads": n_heads,
      "wte": normal(keys[0], (vocab, d), bf16),   # weights stored bf16 for the MXU
      "wpe": normal(keys[1], (max_pos, d)),
      "lnf_g": jnp.ones((1, d), jnp.float32),
      "lnf_b": jnp.zeros((1, d), jnp.float32),
      "adapter_w": normal(keys[2], (d, d), bf16),
      "adapter_b": normal(keys[3], (1, d)),
      "layers": [],
  }
  for li in range(n_layers):
    k = jax.random.split(keys[4 + li], 8)
    params["layers"].append({
        "ln1_g": jnp.ones((1, d), jnp.float32),
        "ln1_b": jnp.zeros((1, d), jnp.float32),
        "w_qkv": normal(k[0], (d, 3 * d), bf16),
        "b_qkv": normal(k[1], (1, 3 * d)),
        "w_o": normal(k[2], (d, d), bf16),
        "b_o": normal(k[3], (1, d)),
        "ln2_g": jnp.ones((1, d), jnp.float32),
        "ln2_b": jnp.zeros((1, d), jnp.float32),
        "w_fc": normal(k[4], (d, 4 * d), bf16),
        "b_fc": normal(k[5], (1, 4 * d)),
        "w_proj": normal(k[6], (4 * d, d), bf16),
        "b_proj": normal(k[7], (1, d)),
    })
  return params


def sonnet_gpt_forward(params, input_ids, attention_mask):
  """Pallas implementation of SonnetGPT.forward: GPT-2 -> adapter -> tied-embedding logits."""
  B, T = input_ids.shape
  d = params["wte"].shape[1]
  H = params["num_heads"]
  dh = d // H
  scale = 1.0 / math.sqrt(dh)

  # embedding gather (XLA glue); dropout is a no-op in eval mode
  x = params["wte"][input_ids].astype(jnp.float32) + params["wpe"][:T][None, :, :]
  mask_add = ((1.0 - attention_mask.astype(jnp.float32)) * -1e4)[:, None, :]   # (B,1,T)

  # TODO(synk): B*T is assumed to be a multiple of 8 (sublane granularity); pad the sequence
  # in the wrapper for arbitrary lengths.
  x2d = x.reshape(B * T, d)
  for layer in params["layers"]:
    # --- attention block (pre-LN): fused LN+QKV (bf16 out), (B,H)-grid attention, fused
    # residual projection.  Head split/merge is cheap bf16 XLA layout glue so every BlockSpec
    # keeps legal (full-dim) last-two block dims.
    qkv = ln_linear(x2d, layer["ln1_g"], layer["ln1_b"],
                    layer["w_qkv"], layer["b_qkv"]).reshape(B, T, 3, H, dh)
    q = qkv[:, :, 0].transpose(0, 2, 1, 3)               # (B, H, T, dh) bf16
    k = qkv[:, :, 1].transpose(0, 2, 1, 3)
    v = qkv[:, :, 2].transpose(0, 2, 1, 3)
    attn = attention(q, k, v, mask_add, scale)            # (B, H, T, dh) bf16
    attn2d = attn.transpose(0, 2, 1, 3).reshape(B * T, d)
    x2d = linear_residual(attn2d, layer["w_o"], layer["b_o"], x2d)
    # --- MLP block (pre-LN): fused LN+FC+GELU (bf16 out), fused residual projection ---
    hmid = ln_linear(x2d, layer["ln2_g"], layer["ln2_b"],
                     layer["w_fc"], layer["b_fc"], activation="gelu")
    x2d = linear_residual(hmid, layer["w_proj"], layer["b_proj"], x2d)

  # final LN + adapter + residual + tied-embedding logits, one kernel, vocab-tiled (padded)
  logits = final_ln_adapter_logits(x2d, params["lnf_g"], params["lnf_b"],
                                   params["adapter_w"], params["adapter_b"],
                                   params["wte"])
  return logits.reshape(B, T, -1)


# ----------------------------- pure-JAX reference ------------------------------


def ref_forward(params, input_ids, attention_mask):
  B, T = input_ids.shape
  d = params["wte"].shape[1]
  H = params["num_heads"]
  dh = d // H
  f32 = lambda a: a.astype(jnp.float32)

  def ln(x, g, b):
    mu = jnp.mean(x, -1, keepdims=True)
    var = jnp.mean(jnp.square(x - mu), -1, keepdims=True)
    return (x - mu) * jax.lax.rsqrt(var + 1e-5) * g + b

  x = f32(params["wte"])[input_ids] + params["wpe"][:T][None]
  mask_add = ((1.0 - attention_mask.astype(jnp.float32)) * -1e4)[:, None, None, :]
  row = jnp.arange(T)[:, None]
  col = jnp.arange(T)[None, :]
  causal = jnp.where(col <= row, 0.0, -1e4)

  def heads(z):
    return z.reshape(B, T, H, dh).transpose(0, 2, 1, 3)

  for layer in params["layers"]:
    h = ln(x, layer["ln1_g"][0], layer["ln1_b"][0])
    qkv = h @ f32(layer["w_qkv"]) + layer["b_qkv"][0]
    q, k, v = jnp.split(qkv, 3, -1)
    s = jnp.einsum("bhqd,bhkd->bhqk", heads(q), heads(k)) / math.sqrt(dh)
    s = s + causal + mask_add
    p = jax.nn.softmax(s, -1)
    a = jnp.einsum("bhqk,bhkd->bhqd", p, heads(v)).transpose(0, 2, 1, 3).reshape(B, T, d)
    x = x + (a @ f32(layer["w_o"]) + layer["b_o"][0])
    h = ln(x, layer["ln2_g"][0], layer["ln2_b"][0])
    m = _gelu_tanh(h @ f32(layer["w_fc"]) + layer["b_fc"][0]) @ f32(layer["w_proj"]) \
        + layer["b_proj"][0]
    x = x + m

  h = ln(x, params["lnf_g"][0], params["lnf_b"][0])
  adapted = _gelu_tanh(h @ f32(params["adapter_w"]) + params["adapter_b"][0])
  h = h + adapted
  return h @ f32(params["wte"]).T


# ----------------------------- main ------------------------------

if __name__ == "__main__":
  # TODO(synk): tokenizer and the autoregressive generate() top-p sampling loop are host-side
  # control flow with no Pallas equivalent; only forward() is implemented here.
  B, T, D, H, L, V, MAXPOS = 2, 8, 32, 2, 2, 128, 16

  key = jax.random.PRNGKey(0)
  params = init_params(key, vocab=V, max_pos=MAXPOS, d=D, n_layers=L, n_heads=H)

  input_ids = jax.random.randint(jax.random.fold_in(key, 123), (B, T), 0, V, dtype=jnp.int32)
  attention_mask = jnp.ones((B, T), dtype=jnp.int32).at[1, T - 2:].set(0)

  logits = sonnet_gpt_forward(params, input_ids, attention_mask)
  logits = jax.block_until_ready(logits)

  ref = ref_forward(params, input_ids, attention_mask)
  assert logits.shape == (B, T, V), logits.shape
  # bf16 matmul operands / bf16 intermediate activations vs a pure-f32 reference -> small drift.
  max_err = float(jnp.max(jnp.abs(logits - ref)))
  assert max_err < 2e-2, f"max abs err vs reference = {max_err}"

  print("KERNEL_OK")
</pallas_src>

<mosaic_0001>
module attributes {stable_mosaic.version = 11 : i64} {
  func.func @_ln_linear_kernel(%arg0: i32, %arg1: i32, %arg2: memref<16x32xf32, #tpu.memory_space<vmem>>, %arg3: memref<1x32xf32, #tpu.memory_space<vmem>>, %arg4: memref<1x32xf32, #tpu.memory_space<vmem>>, %arg5: memref<32x96xbf16, #tpu.memory_space<vmem>>, %arg6: memref<1x96xf32, #tpu.memory_space<vmem>>, %arg7: memref<16x96xbf16, #tpu.memory_space<vmem>>, %arg8: memref<16x32xbf16, #tpu.memory_space<vmem>>) attributes {dimension_semantics = [#tpu.dimension_semantics<parallel>, #tpu.dimension_semantics<arbitrary>], iteration_bounds = array<i64: 1, 1>, scalar_prefetch = 0 : i64, scratch_operands = 1 : i64, tpu.core_type = #tpu.core_type<tc>, window_params = [{transform_indices = @transform_0, window_bounds = array<i64: 16, 32>}, {pipeline_mode = #tpu.pipeline_mode<synchronous>, transform_indices = @transform_1, window_bounds = array<i64: 1, 32>}, {pipeline_mode = #tpu.pipeline_mode<synchronous>, transform_indices = @transform_2, window_bounds = array<i64: 1, 32>}, {transform_indices = @transform_3, window_bounds = array<i64: 32, 96>}, {transform_indices = @transform_4, window_bounds = array<i64: 1, 96>}, {transform_indices = @transform_5, window_bounds = array<i64: 16, 96>}]} {
    %c0_i32 = arith.constant 0 : i32
    %0 = arith.cmpi eq, %arg1, %c0_i32 : i32
    %1 = arith.extui %0 : i1 to i32
    %c0_i32_0 = arith.constant 0 : i32
    %2 = arith.cmpi ne, %1, %c0_i32_0 : i32
    scf.if %2 {
      %c0_8 = arith.constant 0 : index
      %c0_9 = arith.constant 0 : index
      %11 = vector.load %arg2[%c0_8, %c0_9] : memref<16x32xf32, #tpu.memory_space<vmem>>, vector<16x32xf32>
      %cst_10 = arith.constant dense<0.000000e+00> : vector<16xf32>
      %12 = vector.multi_reduction <add>, %11, %cst_10 [1] : vector<16x32xf32> to vector<16xf32>
      %13 = vector.shape_cast %12 : vector<16xf32> to vector<16x1xf32>
      %cst_11 = arith.constant 3.200000e+01 : f32
      %14 = vector.broadcast %cst_11 : f32 to vector<16x1xf32>
      %15 = arith.divf %13, %14 : vector<16x1xf32>
      %16 = vector.broadcast %15 : vector<16x1xf32> to vector<16x32xf32>
      %17 = arith.subf %11, %16 : vector<16x32xf32>
      %18 = arith.mulf %17, %17 : vector<16x32xf32>
      %cst_12 = arith.constant dense<0.000000e+00> : vector<16xf32>
      %19 = vector.multi_reduction <add>, %18, %cst_12 [1] : vector<16x32xf32> to vector<16xf32>
      %20 = vector.shape_cast %19 : vector<16xf32> to vector<16x1xf32>
      %cst_13 = arith.constant 3.200000e+01 : f32
      %21 = vector.broadcast %cst_13 : f32 to vector<16x1xf32>
      %22 = arith.divf %20, %21 : vector<16x1xf32>
      %23 = vector.broadcast %15 : vector<16x1xf32> to vector<16x32xf32>
      %24 = arith.subf %11, %23 : vector<16x32xf32>
      %cst_14 = arith.constant 9.99999974E-6 : f32
      %25 = vector.broadcast %cst_14 : f32 to vector<16x1xf32>
      %26 = arith.addf %22, %25 : vector<16x1xf32>
      %27 = math.rsqrt %26 : vector<16x1xf32>
      %28 = vector.broadcast %27 : vector<16x1xf32> to vector<16x32xf32>
      %29 = arith.mulf %24, %28 : vector<16x32xf32>
      %c0_15 = arith.constant 0 : index
      %c0_16 = arith.constant 0 : index
      %30 = vector.load %arg3[%c0_15, %c0_16] : memref<1x32xf32, #tpu.memory_space<vmem>>, vector<1x32xf32>
      %31 = vector.broadcast %30 : vector<1x32xf32> to vector<16x32xf32>
      %32 = arith.mulf %29, %31 : vector<16x32xf32>
      %c0_17 = arith.constant 0 : index
      %c0_18 = arith.constant 0 : index
      %33 = vector.load %arg4[%c0_17, %c0_18] : memref<1x32xf32, #tpu.memory_space<vmem>>, vector<1x32xf32>
      %34 = vector.broadcast %33 : vector<1x32xf32> to vector<16x32xf32>
      %35 = arith.addf %32, %34 : vector<16x32xf32>
      %36 = arith.truncf %35 : vector<16x32xf32> to vector<16x32xbf16>
      %c0_19 = arith.constant 0 : index
      %c0_20 = arith.constant 0 : index
      %37 = vector.load %arg8[%c0_19, %c0_20] : memref<16x32xbf16, #tpu.memory_space<vmem>>, vector<16x32xbf16>
      tpu.vector_store %arg8[%c0_19, %c0_20], %36 {strides = array<i32>} : memref<16x32xbf16, #tpu.memory_space<vmem>>, vector<16x32xbf16>,
    } else {
    }
    %c0 = arith.constant 0 : index
    %c0_1 = arith.constant 0 : index
    %3 = vector.load %arg8[%c0, %c0_1] : memref<16x32xbf16, #tpu.memory_space<vmem>>, vector<16x32xbf16>
    %c0_2 = arith.constant 0 : index
    %c0_3 = arith.constant 0 : index
    %4 = vector.load %arg5[%c0_2, %c0_3] : memref<32x96xbf16, #tpu.memory_space<vmem>>, vector<32x96xbf16>
    %cst = arith.constant dense<0.000000e+00> : vector<16x96xf32>
    %5 = tpu.matmul %3, %4, %cst {dimension_numbers = #tpu.dot_dimension_numbers<[1], [0], [0], [1], [0, 0, 1, 1], [], []>} : vector<16x32xbf16>, vector<32x96xbf16>, vector<16x96xf32> -> vector<16x96xf32>
    %c0_4 = arith.constant 0 : index
    %c0_5 = arith.constant 0 : index
    %6 = vector.load %arg6[%c0_4, %c0_5] : memref<1x96xf32, #tpu.memory_space<vmem>>, vector<1x96xf32>
    %7 = vector.broadcast %6 : vector<1x96xf32> to vector<16x96xf32>
    %8 = arith.addf %5, %7 : vector<16x96xf32>
    %9 = arith.truncf %8 : vector<16x96xf32> to vector<16x96xbf16>
    %c0_6 = arith.constant 0 : index
    %c0_7 = arith.constant 0 : index
    %10 = vector.load %arg7[%c0_6, %c0_7] : memref<16x96xbf16, #tpu.memory_space<vmem>>, vector<16x96xbf16>
    tpu.vector_store %arg7[%c0_6, %c0_7], %9 {strides = array<i32>} : memref<16x96xbf16, #tpu.memory_space<vmem>>, vector<16x96xbf16>,
    return
  }
  func.func @transform_0(%arg0: i32, %arg1: i32) -> (i32, i32) {
    %c0_i32 = arith.constant 0 : i32
    %c0_i32_0 = arith.constant 0 : i32
    return %arg0, %c0_i32 : i32, i32
  }
  func.func @transform_1(%arg0: i32, %arg1: i32) -> (i32, i32) {
    %c0_i32 = arith.constant 0 : i32
    %c0_i32_0 = arith.constant 0 : i32
    %c0_i32_1 = arith.constant 0 : i32
    return %c0_i32, %c0_i32_0 : i32, i32
  }
  func.func @transform_2(%arg0: i32, %arg1: i32) -> (i32, i32) {
    %c0_i32 = arith.constant 0 : i32
    %c0_i32_0 = arith.constant 0 : i32
    %c0_i32_1 = arith.constant 0 : i32
    return %c0_i32, %c0_i32_0 : i32, i32
  }
  func.func @transform_3(%arg0: i32, %arg1: i32) -> (i32, i32) {
    %c0_i32 = arith.constant 0 : i32
    %c0_i32_0 = arith.constant 0 : i32
    return %c0_i32, %arg1 : i32, i32
  }
  func.func @transform_4(%arg0: i32, %arg1: i32) -> (i32, i32) {
    %c0_i32 = arith.constant 0 : i32
    %c0_i32_0 = arith.constant 0 : i32
    return %c0_i32, %arg1 : i32, i32
  }
  func.func @transform_5(%arg0: i32, %arg1: i32) -> (i32, i32) {
    %c0_i32 = arith.constant 0 : i32
    return %arg0, %arg1 : i32, i32
  }
}

</mosaic_0001>

<bundles_post_ra>
// kernel: tpu_custom_call.1
= control target key start
LH: loop header
LB: loop body
LE: loop exit
PB: predicated region body
PF: predicated region fallthrough
CT: control target
= control target key end

     0   :  { %10 = vsyncpa [#allocation4], 0  ;;  %s549_s0 = inlined_call_operand.hbm [shape: f32[16,32], index: 0, kind: input, shape index: {}]   ;;  %s550_s1 = inlined_call_operand.hbm [shape: f32[1,32], index: 1, kind: input, shape index: {}]   ;;  %s551_s2 = inlined_call_operand.hbm [shape: f32[1,32], index: 2, kind: input, shape index: {}]   ;;  %s552_s3 = inlined_call_operand.hbm [shape: bf16[32,96], index: 3, kind: input, shape index: {}]   ;;  %s553_s4 = inlined_call_operand.hbm [shape: f32[1,96], index: 4, kind: input, shape index: {}]   ;;  %s554_s5 = inlined_call_operand.hbm [shape: bf16[16,96], index: 5, kind: output, shape index: {}]  }
   0x1   :  { %11 = vsyncpa [#allocation7], 0 }
   0x2   :  { %12 = vsyncpa [#allocation10], 0 }
   0x3   :  { %13 = vsyncpa [#allocation5], 0  ;;  %s416_s18 = smov [#allocation6]   ;;  %s417_s20 = smov [#allocation9]  }
   0x4   :  { %s32_s19 = sshll.u32 %s416_s18, 4  ;;  %s51_s21 = sshll.u32 %s417_s20, 4  ;;  %s33_s19 = int_to_ptr.vmem [resolvable:$true] %s32_s19  ;;  %s458_s21 = int_to_ptr.vmem [resolvable:$true] %s51_s21 }
   0x5   :  { %s276_s24 = scalar_lea.hbm %s550_s1, 16 }
   0x6   :  { %p277_p0 = scmp.ne.s32.totalorder %s550_s1, %s276_s24  ;;  %p280_p1 = scmp.lt.u32.totalorder %s276_s24, %s550_s1 }
   0x8   :  { %p282_p2 = pnand %p280_p1, %p277_p0 }
   0xa   :  { %285 = shalt.err (!%p282_p2)
}
   0xb   :  { %s286_s29 = scalar_lea.vmem %s33_s19, 16  ;;  %s290_s30 = scalar_lea.vmem %s33_s19, 32 }
   0xc   :  { %p287_p3 = scmp.ne.s32.totalorder %s33_s19, %s286_s29  ;;  %p291_p4 = scmp.lt.s32.totalorder %s33_s19, %s33_s19 }
   0xd   :  { %p292_p5 = scmp.lt.s32.totalorder %s290_s30, %s286_s29 }
   0xf   :  { %p293_p6 = por %p292_p5, %p291_p4 }
  0x11   :  { %p294_p7 = pnand %p293_p6, %p287_p3 }
  0x13   :  { %297 = shalt.err (!%p294_p7)
}
  0x14   :  { %35 = dma.hbm_to_vmem [thread:$0]  %s550_s1, 16, %s33_s19, [#allocation7]  }
  0x15   :  { %s298_s10 = scalar_lea.hbm %s552_s3, 256 }
  0x16   :  { %p299_p8 = scmp.ne.s32.totalorder %s552_s3, %s298_s10  ;;  %p302_p9 = scmp.lt.u32.totalorder %s298_s10, %s552_s3 }
  0x18   :  { %p304_p10 = pnand %p302_p9, %p299_p8 }
  0x1a   :  { %307 = shalt.err (!%p304_p10)
}
  0x1b   :  { %s308_s15 = scalar_lea.vmem %s458_s21, 256  ;;  %p313_p12 = scmp.lt.s32.totalorder %s458_s21, %s458_s21 }
  0x1c   :  { %p309_p11 = scmp.ne.s32.totalorder %s458_s21, %s308_s15  ;;  %p314_p13 = scmp.lt.s32.totalorder %s308_s15, %s308_s15 }
  0x1e   :  { %p315_p0 = por %p314_p13, %p313_p12 }
  0x20   :  { %p316_p1 = pnand %p315_p0, %p309_p11 }
  0x22   :  { %319 = shalt.err (!%p316_p1)
}
  0x23   :  { %s418_s1 = smov 64   ;;  %s419_s16 = smov 4  }
  0x24   :  { %57 = dma.hbm_to_vmem [thread:$0]  %s552_s3, 256, %s458_s21, [#allocation10], %s418_s1, %s418_s1, %s419_s16  }
  0x25   :  { %s420_s19 = smov [#allocation3]   ;;  %s320_s24 = scalar_lea.hbm %s549_s0, 256 }
  0x26   :  { %s19_s20 = sshll.u32 %s420_s19, 4  ;;  %p321_p2 = scmp.ne.s32.totalorder %s549_s0, %s320_s24  ;;  %s20_s20 = int_to_ptr.vmem [resolvable:$true] %s19_s20 }
  0x27   :  { %p324_p3 = scmp.lt.u32.totalorder %s320_s24, %s549_s0 }
  0x29   :  { %p326_p4 = pnand %p324_p3, %p321_p2 }
  0x2b   :  { %329 = shalt.err (!%p326_p4)
}
  0x2c   :  { %s330_s29 = scalar_lea.vmem %s20_s20, 256  ;;  %p335_p6 = scmp.lt.s32.totalorder %s20_s20, %s20_s20 }
  0x2d   :  { %p331_p5 = scmp.ne.s32.totalorder %s20_s20, %s330_s29  ;;  %p336_p7 = scmp.lt.s32.totalorder %s330_s29, %s330_s29 }
  0x2f   :  { %p337_p8 = por %p336_p7, %p335_p6 }
  0x31   :  { %p338_p9 = pnand %p337_p8, %p331_p5 }
  0x33   :  { %341 = shalt.err (!%p338_p9)
}
  0x34   :  { %s421_s3 = smov 128   ;;  %s422_s21 = smov 8  }
  0x35   :  { %25 = dma.hbm_to_vmem [thread:$0]  %s549_s0, 256, %s20_s20, [#allocation4], %s421_s3, %s421_s3, %s422_s21  }
  0x36   :  { %s423_s7 = smov [#allocation8]   ;;  %s424_s9 = smov [#allocation11]  }
  0x37   :  { %s42_s8 = sshll.u32 %s423_s7, 4  ;;  %s64_s10 = sshll.u32 %s424_s9, 4  ;;  %s43_s8 = int_to_ptr.vmem [resolvable:$true] %s42_s8  ;;  %s65_s10 = int_to_ptr.vmem [resolvable:$true] %s64_s10 }
  0x38   :  { %s342_s13 = scalar_lea.hbm %s551_s2, 16 }
  0x39   :  { %p343_p10 = scmp.ne.s32.totalorder %s551_s2, %s342_s13  ;;  %p346_p11 = scmp.lt.u32.totalorder %s342_s13, %s551_s2 }
  0x3b   :  { %p348_p12 = pnand %p346_p11, %p343_p10 }
  0x3d   :  { %351 = shalt.err (!%p348_p12)
}
  0x3e   :  { %s352_s0 = scalar_lea.vmem %s43_s8, 16  ;;  %s356_s19 = scalar_lea.vmem %s43_s8, 32 }
  0x3f   :  { %p353_p13 = scmp.ne.s32.totalorder %s43_s8, %s352_s0  ;;  %p357_p0 = scmp.lt.s32.totalorder %s43_s8, %s43_s8 }
  0x40   :  { %p358_p1 = scmp.lt.s32.totalorder %s356_s19, %s352_s0 }
  0x42   :  { %p359_p2 = por %p358_p1, %p357_p0 }
  0x44   :  { %p360_p3 = pnand %p359_p2, %p353_p13 }
  0x46   :  { %363 = shalt.err (!%p360_p3)
}
  0x47   :  { %45 = dma.hbm_to_vmem [thread:$0]  %s551_s2, 16, %s43_s8, [#allocation7]  }
  0x48   :  { %s364_s25 = scalar_lea.hbm %s553_s4, 16 }
  0x49   :  { %p365_p4 = scmp.ne.s32.totalorder %s553_s4, %s364_s25  ;;  %p368_p5 = scmp.lt.u32.totalorder %s364_s25, %s553_s4 }
  0x4b   :  { %p370_p6 = pnand %p368_p5, %p365_p4 }
  0x4d   :  { %373 = shalt.err (!%p370_p6)
}
  0x4e   :  { %s374_s3 = scalar_lea.vmem %s65_s10, 16  ;;  %s378_s21 = scalar_lea.vmem %s65_s10, 32 }
  0x4f   :  { %p375_p7 = scmp.ne.s32.totalorder %s65_s10, %s374_s3  ;;  %p379_p8 = scmp.lt.s32.totalorder %s65_s10, %s65_s10 }
  0x50   :  { %p380_p9 = scmp.lt.s32.totalorder %s378_s21, %s374_s3 }
  0x52   :  { %p381_p10 = por %p380_p9, %p379_p8 }
  0x54   :  { %p382_p11 = pnand %p381_p10, %p375_p7 }
  0x56   :  { %385 = shalt.err (!%p382_p11)
}
  0x57   :  { %67 = dma.hbm_to_vmem [thread:$0]  %s553_s4, 16, %s65_s10, [#allocation10]  }
  0x58   :  { %408 = dma.done.wait [#allocation4], 256  }
  0x59   :  { %409 = vsyncadd [#allocation4], 4294967040 }
  0x5a   :  { %410 = dma.done.wait [#allocation7], 32  }
  0x5b   :  { %411 = vsyncadd [#allocation7], 4294967264 }
  0x5c   :  { %412 = dma.done.wait [#allocation10], 272  }
  0x5d   :  { %413 = vsyncadd [#allocation10], 4294967024  ;;  %vm90_vm0 = vcmask 261120   ;;  %v88_v0 = vld [vmem:[#allocation3] sm:$0xff]  ;;  %v89_v1 = vld [vmem:[#allocation3 + $0x8] sm:$0xff]  ;;  %v425_v15 = vmov 0.0  }
  0x5e   :  { %v91_v2 = vsel %vm90_vm0, %v88_v0, 0.0  ;;  %v94_v3 = vsel %vm90_vm0, %v89_v1, 0.0  ;;  %v270_v14 = vld [vmem:[#allocation9] sm:$0xff]   ;;  %250 = vmatprep.subr.bf16.mxu0 %v425_v15  ;;  %v271_v16 = vld [vmem:[#allocation9 + $0x8] sm:$0xff]   ;;  %vm426_vm1 = vmmov 0   ;;  %vm215_vm2 = vcmask 781312  }
  0x5f   :  { %92 = vadd.xlane.f32.xlu0 %v91_v2  ;;  %251 = vmatpush3.bf16.msra.mxu0 %v270_v14  ;;  %v237_v25 = vld [vmem:[#allocation6] ss:$0 sm:$0xff]  ;;  %v238_v29 = vld [vmem:[#allocation8] ss:$0 sm:$0xff]  ;;  %v239_v35 = vld [vmem:[#allocation11] ss:$0 sm:$0xff] }
  0x60   :  { %254 = vmatprep.mubr.msk.bf16.mxu0 %vm426_vm1, %v425_v15  ;;  %252 = vmatprep.subr.bf16.mxu0 %v425_v15  ;;  %s427_s4 = smov [#allocation12]  }
  0x61   :  { %s223_s6 = sshll.u32 %s427_s4, 4  ;;  %s224_s6 = int_to_ptr.vmem [resolvable:$true] %s223_s6 }
  0x62   :  { %s386_s7 = scalar_lea.vmem %s224_s6, 128  ;;  %p391_p13 = scmp.lt.s32.totalorder %s224_s6, %s224_s6 }
  0x63   :  { %95 = vadd.xlane.f32.xlu0 %v94_v3  ;;  %253 = vmatpush3.bf16.msra.mxu0 %v271_v16  ;;  %p387_p12 = scmp.ne.s32.totalorder %s224_s6, %s386_s7  ;;  %p392_p0 = scmp.lt.s32.totalorder %s386_s7, %s386_s7 }
  0x65   :  { %p393_p1 = por %p392_p0, %p391_p13 }
  0x67   :  { %p394_p2 = pnand %p393_p1, %p387_p12 }
  0xec   :  { %v93_v4 = vpop.xlane.xlu0 %92 }
  0xed   :  { %v98_v5 = vmul.f32 0.03125, %v93_v4 }
  0xef   :  { %v100_v6 = vsub.f32 %v88_v0, %v98_v5 }
  0xf0   :  { %v96_v7 = vpop.xlane.xlu0 %95 }
  0xf1   :  { %v99_v8 = vmul.f32 0.03125, %v96_v7  ;;  %v102_v9 = vmul.f32 %v100_v6, %v100_v6 }
  0xf3   :  { %v101_v10 = vsub.f32 %v89_v1, %v99_v8  ;;  %v104_v11 = vsel %vm90_vm0, %v102_v9, 0.0 }
  0xf4   :  { %105 = vadd.xlane.f32.xlu1 %v104_v11 }
  0xf5   :  { %v103_v12 = vmul.f32 %v101_v10, %v101_v10 }
  0xf7   :  { %v107_v13 = vsel %vm90_vm0, %v103_v12, 0.0 }
  0xf8   :  { %108 = vadd.xlane.f32.xlu1 %v107_v13 }
 0x181   :  { %v106_v17 = vpop.xlane.xlu1 %105 }
 0x182   :  { %v110_v18 = vmul.f32 0.03125, %v106_v17 }
 0x184   :  { %v112_v19 = vadd.f32 1e-05, %v110_v18 }
 0x185   :  { %v109_v20 = vpop.xlane.xlu1 %108 }
 0x186   :  { %272 = vrsqrt.f32 %v112_v19  ;;  %v111_v21 = vmul.f32 0.03125, %v109_v20 }
 0x188   :  { %v113_v22 = vadd.f32 1e-05, %v111_v21 }
 0x18a   :  { %274 = vrsqrt.f32 %v113_v22 }
 0x190   :  { %v273_v23 = vpop.eup %272 }
 0x191   :  { %v116_v24 = vmul.f32 %v273_v23, %v100_v6 }
 0x193   :  { %v125_v27 = vmul.f32 %v237_v25, %v116_v24 }
 0x194   :  { %v275_v26 = vpop.eup %274 }
 0x195   :  { %v117_v28 = vmul.f32 %v275_v26, %v101_v10  ;;  %v134_v31 = vadd.f32 %v238_v29, %v125_v27 }
 0x197   :  { %v126_v30 = vmul.f32 %v237_v25, %v117_v28 }
 0x199   :  { %v135_v32 = vadd.f32 %v238_v29, %v126_v30 }
 0x19b   :  { %v136_v33 = vpack.c.bf16 %v135_v32, %v134_v31 }
 0x19d   :  { %137 = vst.msk [vmem:[#allocation2] sm:$0xff] %vm90_vm0, %v136_v33 }
 0x1a4   :  { %v138_v34 = vld [vmem:[#allocation2] sm:$0xff] }
 0x1a5   :  { %255 = vmatmul.mubr.msk.bf16.vlgmr.msra.gmra.mrb[0].mxu0 %vm90_vm0, %v138_v34 }
 0x278   :  { %v200_v36 = vpop.f32.mrb[0].mxu0 }
 0x279   :  { %v201_v37 = vadd.f32 %v239_v35, %v200_v36  ;;  %v256_v38 = vpop.f32.mrb[1].mxu0 }
 0x27a   :  { %v203_v39 = vpop.f32.mrb[2].mxu0 }
 0x27b   :  { %v245_v40 = vpack.c.bf16 %v201_v37, %v201_v37  ;;  %v204_v41 = vadd.f32 %v239_v35, %v203_v39  ;;  %v257_v42 = vpop.f32.mrb[3].mxu0 }
 0x27d   :  { %v246_v43 = vpack.c.bf16 %v204_v41, %v204_v41  ;;  %216 = vst.msk [vmem:[#allocation12] sm:$0xf] %vm215_vm2, %v245_v40 }
 0x27f   :  { %217 = vst.msk [vmem:[#allocation12 + $0x4] sm:$0xf] %vm215_vm2, %v246_v43 }
 0x280   :  { %397 = shalt.err (!%p394_p2)
}
 0x281   :  { %s398_s10 = scalar_lea.hbm %s554_s5, 128 }
 0x282   :  { %p399_p3 = scmp.ne.s32.totalorder %s554_s5, %s398_s10  ;;  %p402_p4 = scmp.lt.u32.totalorder %s398_s10, %s554_s5 }
 0x284   :  { %p404_p5 = pnand %p402_p4, %p399_p3 }
 0x286   :  { %407 = shalt.err (!%p404_p5)
}
 0x287   :  { %229 = dma.vmem_to_hbm [thread:$0]  %s224_s6, 128, %s554_s5, [#allocation5], %s418_s1, %s418_s1, %s419_s16  }
 0x288   :  { %414 = dma.done.wait [#allocation5], 128  }
 0x289   :  { %415 = vsyncadd [#allocation5], 4294967168 }
 0x28a   :  { %233 = vsyncpa [#allocation4], 1 }
 0x28b   :  { %234 = vsyncpa [#allocation7], 1 }
 0x28c   :  { %235 = vsyncpa [#allocation10], 1 }
 0x28d   :  { %236 = vsyncpa [#allocation5], 1 }

</bundles_post_ra>
